<compile_context>
chip_gen: v5e
topology: v5e:2x2
jax: 0.10.0
libtpu: 0.0.40
codegen_flags: <defaults>
</compile_context>

<pallas_src>
import jax
import jax.numpy as jnp
from jax.experimental import pallas as pl
from jax.experimental.pallas import tpu as pltpu


def _round_up(x, m):
    return ((x + m - 1) // m) * m


def _linear_bias_kernel(x_ref, w_ref, b_ref, o_ref):
    # x_ref: (tm, K) bf16   w_ref: (K, tn) bf16   b_ref: (1, tn) f32
    # o_ref: (tm, tn) out_dtype
    acc = jnp.dot(x_ref[...], w_ref[...], preferred_element_type=jnp.float32)
    o_ref[...] = (acc + b_ref[...]).astype(o_ref.dtype)


def pallas_linear(x2d, w_padded, b_padded, n_valid, *, tm=256, tn=2048,
                  out_dtype=jnp.float32):
    """y = x2d @ w + b with a pre-padded, pre-cast weight.

    x2d:      (M, K)  any float dtype (cast to bf16 for the MXU)
    w_padded: (K, Np) bf16, Np a multiple of 128 (padded columns are zero)
    b_padded: (1, Np) f32
    n_valid:  real output width N (<= Np)
    returns   (M, n_valid) out_dtype
    """
    M, K = x2d.shape
    Kw, Np = w_padded.shape
    assert Kw == K
    assert Np % 128 == 0 and n_valid <= Np

    # ---- tile selection -----------------------------------------------------
    # M tile: multiple of 16 (bf16 packs 16 rows per vreg sublane group).
    tm_eff = min(tm, _round_up(M, 16))
    tm_eff = _round_up(tm_eff, 16)
    Mp = _round_up(M, tm_eff)
    # N tile: largest 128-multiple divisor of Np not exceeding the target, so
    # every output store is a full-width (lane-dense) vst and Np % tn_eff == 0.
    tn_eff = 128
    for d in range(min(tn, Np) // 128, 0, -1):
        cand = d * 128
        if Np % cand == 0:
            tn_eff = cand
            break

    x2d = x2d.astype(jnp.bfloat16)
    if Mp != M:
        x2d = jnp.pad(x2d, ((0, Mp - M), (0, 0)))

    n_m = Mp // tm_eff
    n_n = Np // tn_eff

    # ---- adaptive grid ordering (minimize total HBM traffic) ----------------
    x_bytes = Mp * K * 2
    w_bytes = K * Np * 2
    out_itemsize = jnp.dtype(out_dtype).itemsize
    o_bytes = Mp * Np * out_itemsize
    if w_bytes + x_bytes * n_n <= x_bytes + w_bytes * n_m:
        # Decode regime: N outer / M inner -> weight tile DMA'd once per N tile
        # and reused across all M tiles; only the small activation is re-fetched.
        grid = (n_n, n_m)
        x_spec = pl.BlockSpec((tm_eff, K), lambda j, i: (i, 0))
        w_spec = pl.BlockSpec((K, tn_eff), lambda j, i: (0, j))
        b_spec = pl.BlockSpec((1, tn_eff), lambda j, i: (0, j))
        o_spec = pl.BlockSpec((tm_eff, tn_eff), lambda j, i: (i, j))
    else:
        # Prefill regime (large M): M outer / N inner -> activation streamed
        # once, weight re-fetched per M tile (cheaper than the converse here).
        grid = (n_m, n_n)
        x_spec = pl.BlockSpec((tm_eff, K), lambda i, j: (i, 0))
        w_spec = pl.BlockSpec((K, tn_eff), lambda i, j: (0, j))
        b_spec = pl.BlockSpec((1, tn_eff), lambda i, j: (0, j))
        o_spec = pl.BlockSpec((tm_eff, tn_eff), lambda i, j: (i, j))

    # ---- VMEM budget: double-buffered x/w/bias/out tiles + headroom ---------
    tile_footprint = 2 * (tm_eff * K * 2 + K * tn_eff * 2 + tn_eff * 4
                          + tm_eff * tn_eff * out_itemsize)
    vmem_limit = int(min(max(tile_footprint + (8 << 20), 32 << 20), 48 << 20))

    cost = pl.CostEstimate(
        flops=2 * M * K * n_valid,
        transcendentals=0,
        bytes_accessed=x_bytes + w_bytes + Np * 4 + o_bytes,
    )

    # TODO(synk): weight-only quantized paths (int8 on v5e/v6e, fp8-e4m3 on
    # v7x) would halve weight HBM traffic again; needs end-to-end logit
    # validation, so not enabled here.
    # TODO(synk): if an xprof profile shows DMA issue gaps between N tiles,
    # try pipeline_mode=pl.Buffered(3) on the weight BlockSpec.
    out = pl.pallas_call(
        _linear_bias_kernel,
        out_shape=jax.ShapeDtypeStruct((Mp, Np), out_dtype),
        grid_spec=pltpu.PrefetchScalarGridSpec(
            num_scalar_prefetch=0,
            grid=grid,
            in_specs=[x_spec, w_spec, b_spec],
            out_specs=o_spec,
        ),
        compiler_params=pltpu.CompilerParams(
            dimension_semantics=("parallel", "parallel"),
            vmem_limit_bytes=vmem_limit,
        ),
        cost_estimate=cost,
    )(x2d, w_padded, b_padded)

    if Mp != M or Np != n_valid:
        out = out[:M, :n_valid]
    return out


class ARDecoderPallas:
    """JAX/Pallas port of ARDecoder (Linear + view + 'b t c n -> b c t n')."""

    def __init__(self, indim, codebooknum, maxid, key, *, out_dtype=jnp.float32):
        self.indim = indim
        self.codebooknum = codebooknum
        self.maxid = maxid
        self.outdim = codebooknum * maxid
        self.out_dtype = out_dtype

        outdim_p = _round_up(self.outdim, 128)
        k_w, k_b = jax.random.split(key)
        # Deterministic init mimicking torch.nn.Linear's U(-1/sqrt(indim), ...).
        bound = 1.0 / (indim ** 0.5)
        # PyTorch weight is (outdim, indim); store transposed (indim, outdim) so
        # the MXU sees a plain (M,K)@(K,N).  Cast to bf16 and lane-pad to a
        # multiple of 128 ONCE here (per-call cast/pad would re-materialize the
        # full weight in HBM every decode step).
        w = jax.random.uniform(
            k_w, (indim, self.outdim), jnp.float32, minval=-bound, maxval=bound
        ).astype(jnp.bfloat16)
        b = jax.random.uniform(
            k_b, (1, self.outdim), jnp.float32, minval=-bound, maxval=bound
        )
        self.weight = jnp.pad(w, ((0, 0), (0, outdim_p - self.outdim)))
        self.bias = jnp.pad(b, ((0, 0), (0, outdim_p - self.outdim)))
        # TODO(synk): if indim < 128 in production, this op under-utilizes the
        # MXU and should be fused into the upstream projection instead.

    def __call__(self, x):
        # x: (bs, t, indim)
        bs, t, indim = x.shape
        assert indim == self.indim
        x2d = x.reshape(bs * t, indim)
        y2d = pallas_linear(x2d, self.weight, self.bias, self.outdim,
                            out_dtype=self.out_dtype)   # (bs*t, maxid*codebooknum)
        y = y2d.reshape(bs, t, self.maxid, self.codebooknum)    # b t c n
        # Kept outside the kernel: fusing into out_specs would make stores
        # lane-sparse (last dim = codebooknum << 128).
        # TODO(synk): downstream consumers would be better served by keeping the
        # natural (b, t, c, n) layout and folding this permute into them.
        y = jnp.transpose(y, (0, 2, 1, 3))                      # b c t n
        return y


if __name__ == "__main__":
    key = jax.random.PRNGKey(0)
    k_param, k_x = jax.random.split(key)

    bs, t, indim = 2, 8, 32
    codebooknum, maxid = 4, 16

    decoder = ARDecoderPallas(indim, codebooknum, maxid, k_param)
    x = jax.random.normal(k_x, (bs, t, indim), jnp.float32)

    out = decoder(x)
    out = jax.block_until_ready(out)

    # Sanity check against a pure-JAX reference using the same bf16 operands
    # (bf16 MXU matmul, f32 accumulation, f32 bias add).
    outdim = codebooknum * maxid
    x_bf = x.reshape(bs * t, indim).astype(jnp.bfloat16)
    ref2d = jnp.dot(x_bf, decoder.weight[:, :outdim],
                    preferred_element_type=jnp.float32) + decoder.bias[:, :outdim]
    ref = ref2d.reshape(bs, t, maxid, codebooknum).transpose(0, 2, 1, 3)

    assert out.shape == (bs, maxid, t, codebooknum)
    assert out.dtype == jnp.float32
    assert jnp.allclose(out, ref, atol=1e-2, rtol=1e-2)

    print("KERNEL_OK")
</pallas_src>

<mosaic_0001>
module attributes {stable_mosaic.version = 11 : i64} {
  func.func @_linear_bias_kernel(%arg0: i32, %arg1: i32, %arg2: memref<16x32xbf16, #tpu.memory_space<vmem>>, %arg3: memref<32x128xbf16, #tpu.memory_space<vmem>>, %arg4: memref<1x128xf32, #tpu.memory_space<vmem>>, %arg5: memref<16x128xf32, #tpu.memory_space<vmem>>) attributes {dimension_semantics = [#tpu.dimension_semantics<parallel>, #tpu.dimension_semantics<parallel>], iteration_bounds = array<i64: 1, 1>, scalar_prefetch = 0 : i64, scratch_operands = 0 : i64, tpu.core_type = #tpu.core_type<tc>, window_params = [{transform_indices = @transform_0, window_bounds = array<i64: 16, 32>}, {transform_indices = @transform_1, window_bounds = array<i64: 32, 128>}, {transform_indices = @transform_2, window_bounds = array<i64: 1, 128>}, {transform_indices = @transform_3, window_bounds = array<i64: 16, 128>}]} {
    %c0 = arith.constant 0 : index
    %c0_0 = arith.constant 0 : index
    %0 = vector.load %arg2[%c0, %c0_0] : memref<16x32xbf16, #tpu.memory_space<vmem>>, vector<16x32xbf16>
    %c0_1 = arith.constant 0 : index
    %c0_2 = arith.constant 0 : index
    %1 = vector.load %arg3[%c0_1, %c0_2] : memref<32x128xbf16, #tpu.memory_space<vmem>>, vector<32x128xbf16>
    %cst = arith.constant dense<0.000000e+00> : vector<16x128xf32>
    %2 = tpu.matmul %0, %1, %cst {dimension_numbers = #tpu.dot_dimension_numbers<[1], [0], [0], [1], [0, 0, 1, 1], [], []>} : vector<16x32xbf16>, vector<32x128xbf16>, vector<16x128xf32> -> vector<16x128xf32>
    %c0_3 = arith.constant 0 : index
    %c0_4 = arith.constant 0 : index
    %3 = vector.load %arg4[%c0_3, %c0_4] : memref<1x128xf32, #tpu.memory_space<vmem>>, vector<1x128xf32>
    %4 = vector.broadcast %3 : vector<1x128xf32> to vector<16x128xf32>
    %5 = arith.addf %2, %4 : vector<16x128xf32>
    %c0_5 = arith.constant 0 : index
    %c0_6 = arith.constant 0 : index
    %6 = vector.load %arg5[%c0_5, %c0_6] : memref<16x128xf32, #tpu.memory_space<vmem>>, vector<16x128xf32>
    tpu.vector_store %arg5[%c0_5, %c0_6], %5 {strides = array<i32>} : memref<16x128xf32, #tpu.memory_space<vmem>>, vector<16x128xf32>,
    return
  }
  func.func @transform_0(%arg0: i32, %arg1: i32) -> (i32, i32) {
    %c0_i32 = arith.constant 0 : i32
    %c0_i32_0 = arith.constant 0 : i32
    return %arg1, %c0_i32 : i32, i32
  }
  func.func @transform_1(%arg0: i32, %arg1: i32) -> (i32, i32) {
    %c0_i32 = arith.constant 0 : i32
    %c0_i32_0 = arith.constant 0 : i32
    return %c0_i32, %arg0 : i32, i32
  }
  func.func @transform_2(%arg0: i32, %arg1: i32) -> (i32, i32) {
    %c0_i32 = arith.constant 0 : i32
    %c0_i32_0 = arith.constant 0 : i32
    return %c0_i32, %arg0 : i32, i32
  }
  func.func @transform_3(%arg0: i32, %arg1: i32) -> (i32, i32) {
    %c0_i32 = arith.constant 0 : i32
    return %arg1, %arg0 : i32, i32
  }
}

</mosaic_0001>

<bundles_post_ra>
// kernel: tpu_custom_call.1
= control target key start
LH: loop header
LB: loop body
LE: loop exit
PB: predicated region body
PF: predicated region fallthrough
CT: control target
= control target key end

     0   :  { %8 = vsyncpa [#allocation3], 0  ;;  %s256_s0 = inlined_call_operand.hbm [shape: bf16[16,32], index: 0, kind: input, shape index: {}]   ;;  %s257_s1 = inlined_call_operand.hbm [shape: bf16[32,128], index: 1, kind: input, shape index: {}]   ;;  %s258_s2 = inlined_call_operand.vmem [shape: f32[1,128], index: 2, kind: input, shape index: {}]   ;;  %s259_s3 = inlined_call_operand.hbm [shape: f32[16,128], index: 3, kind: output, shape index: {}]  }
   0x1   :  { %9 = vsyncpa [#allocation6], 0 }
   0x2   :  { %10 = vsyncpa [#allocation4], 0  ;;  %s15_s14 = sshll.u32 %s256_s0, 4  ;;  %s217_s15 = smov [#allocation2]   ;;  %s16_s14 = int_to_ptr.hbm [resolvable:$true] %s15_s14 }
   0x3   :  { %s17_s16 = sshll.u32 %s217_s15, 4  ;;  %s28_s19 = sshll.u32 %s257_s1, 4  ;;  %s18_s16 = int_to_ptr.vmem [resolvable:$true] %s17_s16  ;;  %s29_s19 = int_to_ptr.hbm [resolvable:$true] %s28_s19 }
   0x4   :  { %s218_s20 = smov 64   ;;  %s219_s21 = smov 4  }
   0x5   :  { %23 = dma.hbm_to_vmem [thread:$0]  %s16_s14, 128, %s18_s16, [#allocation3], %s218_s20, %s218_s20, %s219_s21  }
   0x6   :  { %s220_s22 = smov [#allocation5]  }
   0x7   :  { %s30_s23 = sshll.u32 %s220_s22, 4  ;;  %s31_s23 = int_to_ptr.vmem [resolvable:$true] %s30_s23 }
   0x8   :  { %36 = dma.hbm_to_vmem [thread:$0]  %s29_s19, 256, %s31_s23, [#allocation6], %s218_s20, %s218_s20, %s219_s21  }
   0x9   :  { %211 = dma.done.wait [#allocation3], 128  }
   0xa   :  { %212 = vsyncadd [#allocation3], 4294967168 }
   0xb   :  { %213 = dma.done.wait [#allocation6], 256  }
   0xc   :  { %214 = vsyncadd [#allocation6], 4294967040  ;;  %v130_v0 = vld [vmem:[#allocation5 + $0x8] sm:$0xff]  ;;  %v129_v1 = vld [vmem:[#allocation5] sm:$0xff]  ;;  %vm75_vm0 = vcmask 261120   ;;  %s221_s24 = smov [#allocation7]  }
   0xd   :  { %85 = vmatpush.bf16.msra.mxu0 %v130_v0  ;;  %v128_v2 = vld [vmem:[#allocation2] sm:$0xff]  ;;  %s99_s25 = sshll.u32 %s221_s24, 4  ;;  %s101_s28 = sshll.u32 %s259_s3, 4  ;;  %s100_s25 = int_to_ptr.vmem [resolvable:$true] %s99_s25  ;;  %s102_s28 = int_to_ptr.hbm [resolvable:$true] %s101_s28 }
   0xe   :  { %v138_v3 = vld [vmem:[%s258_s2] ss:$0 sm:$0xff]  ;;  %s222_s29 = smov 128   ;;  %s223_s30 = smov 8  }
  0x11   :  { %86 = vmatpush.bf16.msra.mxu0 %v129_v1 }
  0x14   :  { %127 = vmatmul.msk.bf16.vlgmr.msra.gmra.mxu0 %vm75_vm0, %v128_v2 }
  0x91   :  { %v88_v4 = vpop.f32.mrf.mxu0 }
  0x92   :  { %v89_v5 = vadd.f32 %v138_v3, %v88_v4 }
  0x94   :  { %93 = vst [vmem:[#allocation7] sm:$0xff] %v89_v5 }
  0x99   :  { %v90_v6 = vpop.f32.mrf.mxu0 }
  0x9a   :  { %v91_v7 = vadd.f32 %v138_v3, %v90_v6 }
  0x9c   :  { %94 = vst [vmem:[#allocation7 + $0x8] sm:$0xff] %v91_v7 }
  0x9d   :  { %107 = dma.vmem_to_hbm [thread:$0]  %s100_s25, 256, %s102_s28, [#allocation4], %s222_s29, %s222_s29, %s223_s30  }
  0x9e   :  { %215 = dma.done.wait [#allocation4], 256  }
  0x9f   :  { %216 = vsyncadd [#allocation4], 4294967040 }
  0xa0   :  { %112 = vsyncpa [#allocation3], 1 }
  0xa1   :  { %113 = vsyncpa [#allocation6], 1 }
  0xa2   :  { %114 = vsyncpa [#allocation4], 1 }

</bundles_post_ra>
